<compile_context>
chip_gen: v6e
topology: v6e:2x2x1
jax: 0.10.0
libtpu: 0.0.40
codegen_flags: <defaults>
</compile_context>

<pallas_src>
import functools

import jax
import jax.numpy as jnp
from jax.experimental import pallas as pl
from jax.experimental.pallas import tpu as pltpu


def _round_up(x, m):
    return ((x + m - 1) // m) * m


def _sublanes(dtype):
    """Packed sublane granularity for a dtype: 8 rows f32, 16 bf16, 32 int8/fp8."""
    return 8 * max(1, 4 // jnp.dtype(dtype).itemsize)


def _choose_batch_per_tile(n, seg_len, target_rows, sublane):
    """Pick batch-elements-per-tile.

    Only divisors of `n` are considered (no padded garbage rows); prefers the largest
    divisor whose row count is sublane-aligned, fits `target_rows`, and still leaves
    >= 2 grid tiles (so v7x megacore sharding has work for both TensorCores).
    Falls back to a single full-array tile (exempt from the (8,128) constraint).
    """
    cands = [b for b in range(1, n + 1)
             if n % b == 0 and (b * seg_len) % sublane == 0]
    if not cands:
        return n  # single tile covering the whole array
    target_b = max(1, target_rows // seg_len)
    multi = [b for b in cands if b <= target_b and n // b >= 2]
    if multi:
        return max(multi)
    fits = [b for b in cands if b <= target_b]
    if fits:
        return max(fits)
    return min(cands)


# ---------------------------------------------------------------------------
# Kernel
# ---------------------------------------------------------------------------
def basic_block_kernel(x_ref, w1_ref, b1_ref, w2_ref, b2_ref, o_ref, *, seg_len):
    """One row-tile of the flattened (N*L, C_pad) channels-last activation.

    x_ref : (TR, C_pad) f32     input rows; TR = integer number of length-`seg_len`
                                segments, each segment = one batch element.
    w1_ref: (3, C_pad, C_pad)   conv1 weight taps (BN1 scale folded into cout), mxu dtype.
    b1_ref: (1, C_pad) f32      BN1 shift.
    w2_ref: (3, C_pad, C_pad)   conv2 weight taps (BN2 scale folded in), mxu dtype.
    b2_ref: (1, C_pad) f32      BN2 shift.
    o_ref : (TR, C_pad)         output rows (out dtype).
    """
    x = x_ref[...]                      # f32 tile; residual stays exact
    rows = x.shape[0]
    dot_dtype = w1_ref.dtype

    # Segment-local row index; masks the k=3 halo at segment boundaries so the shifted
    # taps reproduce Conv1d's zero padding and never leak across batch elements.
    local = jax.lax.broadcasted_iota(jnp.int32, (rows, 1), 0) % seg_len
    not_first = local != 0
    not_last = local != (seg_len - 1)

    def conv3(h, w_ref):
        # x[l-1] / x[l+1] via XLU sublane rotates + boundary masks (f32 VALU work, v5e-safe).
        # (-1) % rows == rows - 1: non-negative amount, still a single-step sublane rotate.
        h_m1 = jnp.where(not_first, pltpu.roll(h, 1, axis=0), 0.0)
        h_p1 = jnp.where(not_last, pltpu.roll(h, (-1) % rows, axis=0), 0.0)
        # Three K=C_pad MXU dots accumulated in f32 (MRB in-place accumulate on v7x);
        # no (TR, 3*C_pad) VMEM concat temp.  Cast to MXU dtype only at the dot operands.
        y = jnp.dot(h_m1.astype(dot_dtype), w_ref[0], preferred_element_type=jnp.float32)
        y = y + jnp.dot(h.astype(dot_dtype), w_ref[1], preferred_element_type=jnp.float32)
        y = y + jnp.dot(h_p1.astype(dot_dtype), w_ref[2], preferred_element_type=jnp.float32)
        return y

    h1 = jnp.maximum(conv3(x, w1_ref) + b1_ref[...], 0.0)     # conv1 + bn1 + relu  (f32)
    h2 = conv3(h1, w2_ref) + b2_ref[...]                       # conv2 + bn2         (f32)
    o_ref[...] = jnp.maximum(h2 + x, 0.0).astype(o_ref.dtype)  # + identity, relu, cast


# ---------------------------------------------------------------------------
# Host-side helpers / wrappers
# ---------------------------------------------------------------------------
def fold_bn_into_conv(w_torch, gamma, beta, mean, var, c_pad, eps, mxu_dtype):
    """torch (Cout, Cin, 3) conv weight + eval-mode BN -> ((3, C_pad, C_pad), (1, C_pad))."""
    cout, cin, _ = w_torch.shape
    inv = gamma / jnp.sqrt(var + eps)
    w = jnp.transpose(w_torch, (2, 1, 0)) * inv[None, None, :]          # (3, Cin, Cout), scaled
    w = jnp.pad(w, ((0, 0), (0, c_pad - cin), (0, c_pad - cout)))       # lane-dense pad
    b = jnp.pad((beta - mean * inv).reshape(1, cout), ((0, 0), (0, c_pad - cout)))
    return w.astype(mxu_dtype), b.astype(jnp.float32)


def basic_block_rows(x_rows, w1, b1, w2, b2, *, seg_len, out_dtype=None, target_rows=2048):
    """Core entry point on channels-last, lane-padded activations.

    x_rows: (N*seg_len, C_pad) float32 (channels-last; a full ResNet should keep activations
            in this layout between blocks so the transpose/pad is paid once per network).
    """
    rows_total, c_pad = x_rows.shape
    assert rows_total % seg_len == 0
    n = rows_total // seg_len
    out_dtype = x_rows.dtype if out_dtype is None else out_dtype

    sub = max(_sublanes(x_rows.dtype), _sublanes(out_dtype))
    # Clamp the row tile by a rough per-tile VMEM footprint: ~8 tile-sized f32 arrays
    # (double-buffered in/out DMA buffers + in-kernel live temps), budget 40 MiB so the
    # same tiling fits v7x's 64 MiB VMEM with compiler scratch headroom.
    max_rows = max(sub, (40 * 1024 * 1024) // (c_pad * 4 * 8))
    target_rows = min(target_rows, max_rows)

    bpt = _choose_batch_per_tile(n, seg_len, target_rows, sub)
    tile_rows = bpt * seg_len
    num_tiles = n // bpt

    kernel = functools.partial(basic_block_kernel, seg_len=seg_len)
    return pl.pallas_call(
        kernel,
        out_shape=jax.ShapeDtypeStruct((rows_total, c_pad), out_dtype),
        grid_spec=pltpu.PrefetchScalarGridSpec(
            num_scalar_prefetch=0,
            grid=(num_tiles,),
            in_specs=[
                pl.BlockSpec((tile_rows, c_pad), lambda i: (i, 0)),     # x row-chunk (f32)
                pl.BlockSpec((3, c_pad, c_pad), lambda i: (0, 0, 0)),   # w1 taps (resident)
                pl.BlockSpec((1, c_pad), lambda i: (0, 0)),             # bn1 shift
                pl.BlockSpec((3, c_pad, c_pad), lambda i: (0, 0, 0)),   # w2 taps (resident)
                pl.BlockSpec((1, c_pad), lambda i: (0, 0)),             # bn2 shift
            ],
            out_specs=pl.BlockSpec((tile_rows, c_pad), lambda i: (i, 0)),
        ),
        compiler_params=pltpu.CompilerParams(
            dimension_semantics=("parallel",),        # independent tiles -> megacore shardable
            vmem_limit_bytes=48 * 1024 * 1024,        # stays inside v7x's 64 MiB physical VMEM
        ),
    )(x_rows, w1, b1, w2, b2)


def basic_block_forward(
    x_ncl, w1_t, w2_t, g1, be1, m1, v1, g2, be2, m2, v2,
    eps=1e-5, mxu_dtype=jnp.bfloat16, out_dtype=None, target_rows=2048,
):
    """Torch-layout wrapper. x_ncl: (N, C, L); conv weights in torch layout (Cout, Cin, 3).

    mxu_dtype: matmul-operand dtype (bf16 default: the MXU is bf16-native on v5e/v6e/v7x);
    accumulation, masks, ReLU and the residual add are always f32.
    """
    n, c, l = x_ncl.shape
    cout = w1_t.shape[0]
    assert cout == c, "residual add requires in_channel == out_channel (downsample=None)"
    c_pad = _round_up(c, 128)

    # Fold eval-mode BN into conv weights / per-channel shifts (host-side algebra).
    w1, b1 = fold_bn_into_conv(w1_t, g1, be1, m1, v1, c_pad, eps, mxu_dtype)
    w2, b2 = fold_bn_into_conv(w2_t, g2, be2, m2, v2, c_pad, eps, mxu_dtype)

    # Layout conversion paid once per call here; a full ResNet should keep activations in the
    # channels-last (N*L, C_pad) f32 layout and call basic_block_rows directly between blocks.
    x = jnp.transpose(x_ncl, (0, 2, 1)).astype(jnp.float32)     # (N, L, C) channels-last
    x = jnp.pad(x, ((0, 0), (0, 0), (0, c_pad - c))).reshape(n * l, c_pad)

    out = basic_block_rows(x, w1, b1, w2, b2, seg_len=l,
                           out_dtype=jnp.float32 if out_dtype is None else out_dtype,
                           target_rows=target_rows)
    out = out.reshape(n, l, c_pad)[:, :, :cout]
    return jnp.transpose(out, (0, 2, 1)).astype(x_ncl.dtype)


# ---------------------------------------------------------------------------
# Plain-JAX reference (torch semantics, eval-mode BN)
# ---------------------------------------------------------------------------
def reference_forward(x_ncl, w1_t, w2_t, g1, be1, m1, v1, g2, be2, m2, v2, eps=1e-5):
    def conv1d(x, w):  # x: (N,C,L), w: (Cout,Cin,3), stride 1, pad 1, no bias
        return jax.lax.conv_general_dilated(
            x, w, window_strides=(1,), padding=((1, 1),),
            dimension_numbers=("NCH", "OIH", "NCH"))

    def bn(x, g, b, m, v):
        return (x - m[None, :, None]) / jnp.sqrt(v[None, :, None] + eps) \
            * g[None, :, None] + b[None, :, None]

    out = conv1d(x_ncl, w1_t)
    out = jnp.maximum(bn(out, g1, be1, m1, v1), 0.0)
    out = conv1d(out, w2_t)
    out = bn(out, g2, be2, m2, v2)
    out = out + x_ncl
    return jnp.maximum(out, 0.0)


if __name__ == "__main__":
    key = jax.random.PRNGKey(0)
    N, C, L = 2, 16, 16  # batch, channels (in == out), sequence length

    ks = jax.random.split(key, 10)
    x = jax.random.normal(ks[0], (N, C, L), dtype=jnp.float32)

    # Conv weights, torch layout (Cout, Cin, 3), bias=False
    w1_t = jax.random.normal(ks[1], (C, C, 3), dtype=jnp.float32) * 0.1
    w2_t = jax.random.normal(ks[2], (C, C, 3), dtype=jnp.float32) * 0.1

    # BatchNorm parameters (deterministic, nontrivial)
    g1 = 1.0 + 0.1 * jax.random.normal(ks[3], (C,), dtype=jnp.float32)
    be1 = 0.1 * jax.random.normal(ks[4], (C,), dtype=jnp.float32)
    m1 = 0.1 * jax.random.normal(ks[5], (C,), dtype=jnp.float32)
    v1 = 1.0 + 0.1 * jax.nn.softplus(jax.random.normal(ks[6], (C,), dtype=jnp.float32))
    g2 = 1.0 + 0.1 * jax.random.normal(ks[7], (C,), dtype=jnp.float32)
    be2 = 0.1 * jax.random.normal(ks[8], (C,), dtype=jnp.float32)
    m2 = 0.1 * jax.random.normal(ks[9], (C,), dtype=jnp.float32)
    v2 = jnp.ones((C,), dtype=jnp.float32)

    params = (w1_t, w2_t, g1, be1, m1, v1, g2, be2, m2, v2)
    ref = reference_forward(x, *params)

    # Default fast path: bf16 MXU operands, f32 accumulation / residual.
    out_bf16 = jax.block_until_ready(basic_block_forward(x, *params))
    assert out_bf16.shape == (N, C, L)
    assert jnp.allclose(out_bf16, ref, atol=5e-2, rtol=5e-2), "bf16-path mismatch vs reference"

    # Exact path: f32 MXU operands, tight tolerance.
    out_f32 = jax.block_until_ready(basic_block_forward(x, *params, mxu_dtype=jnp.float32))
    assert jnp.allclose(out_f32, ref, atol=1e-4, rtol=1e-4), "f32-path mismatch vs reference"

    print("KERNEL_OK")
</pallas_src>

<mosaic_0001>
module attributes {stable_mosaic.version = 11 : i64} {
  func.func @basic_block_kernel(%arg0: i32, %arg1: memref<16x128xf32, #tpu.memory_space<vmem>>, %arg2: memref<3x128x128xbf16, #tpu.memory_space<vmem>>, %arg3: memref<1x128xf32, #tpu.memory_space<vmem>>, %arg4: memref<3x128x128xbf16, #tpu.memory_space<vmem>>, %arg5: memref<1x128xf32, #tpu.memory_space<vmem>>, %arg6: memref<16x128xf32, #tpu.memory_space<vmem>>) attributes {dimension_semantics = [#tpu.dimension_semantics<parallel>], iteration_bounds = array<i64: 2>, scalar_prefetch = 0 : i64, scratch_operands = 0 : i64, tpu.core_type = #tpu.core_type<tc>, window_params = [{transform_indices = @transform_0, window_bounds = array<i64: 16, 128>}, {pipeline_mode = #tpu.pipeline_mode<synchronous>, transform_indices = @transform_1, window_bounds = array<i64: 3, 128, 128>}, {pipeline_mode = #tpu.pipeline_mode<synchronous>, transform_indices = @transform_2, window_bounds = array<i64: 1, 128>}, {pipeline_mode = #tpu.pipeline_mode<synchronous>, transform_indices = @transform_3, window_bounds = array<i64: 3, 128, 128>}, {pipeline_mode = #tpu.pipeline_mode<synchronous>, transform_indices = @transform_4, window_bounds = array<i64: 1, 128>}, {transform_indices = @transform_5, window_bounds = array<i64: 16, 128>}]} {
    %c0 = arith.constant 0 : index
    %c0_0 = arith.constant 0 : index
    %0 = vector.load %arg1[%c0, %c0_0] : memref<16x128xf32, #tpu.memory_space<vmem>>, vector<16x128xf32>
    %1 = tpu.iota {dimensions = array<i32: 0>} : vector<16x1xi32>
    %c16_i32 = arith.constant 16 : i32
    %c0_i32 = arith.constant 0 : i32
    %2 = arith.cmpi eq, %c16_i32, %c0_i32 : i32
    %c1_i32 = arith.constant 1 : i32
    %3 = arith.select %2, %c1_i32, %c16_i32 : i32
    %4 = vector.broadcast %3 : i32 to vector<16x1xi32>
    %5 = arith.remsi %1, %4 : vector<16x1xi32>
    %c0_i32_1 = arith.constant 0 : i32
    %6 = vector.broadcast %c0_i32_1 : i32 to vector<16x1xi32>
    %7 = arith.cmpi ne, %5, %6 : vector<16x1xi32>
    %c0_i32_2 = arith.constant 0 : i32
    %8 = vector.broadcast %c0_i32_2 : i32 to vector<16x1xi32>
    %9 = arith.cmpi slt, %5, %8 : vector<16x1xi32>
    %c0_i32_3 = arith.constant 0 : i32
    %10 = arith.cmpi slt, %3, %c0_i32_3 : i32
    %11 = vector.broadcast %10 : i1 to vector<16x1xi1>
    %12 = vector.broadcast %11 : vector<16x1xi1> to vector<16x1xi1>
    %13 = arith.xori %9, %12 : vector<16x1xi1>
    %14 = arith.andi %13, %7 : vector<16x1xi1>
    %15 = vector.broadcast %3 : i32 to vector<16x1xi32>
    %16 = arith.addi %5, %15 : vector<16x1xi32>
    %17 = arith.select %14, %16, %5 : vector<16x1xi1>, vector<16x1xi32>
    %c0_i32_4 = arith.constant 0 : i32
    %18 = vector.broadcast %c0_i32_4 : i32 to vector<16x1xi32>
    %19 = arith.cmpi ne, %17, %18 : vector<16x1xi32>
    %c15_i32 = arith.constant 15 : i32
    %20 = vector.broadcast %c15_i32 : i32 to vector<16x1xi32>
    %21 = arith.cmpi ne, %17, %20 : vector<16x1xi32>
    %c1_i32_5 = arith.constant 1 : i32
    %22 = tpu.dynamic_rotate %0 by %c1_i32_5 dim 0 : vector<16x128xf32>, i32 -> vector<16x128xf32>
    %cst = arith.constant 0.000000e+00 : f32
    %23 = vector.shape_cast %19 : vector<16x1xi1> to vector<16x1xi1>
    %24 = vector.broadcast %23 : vector<16x1xi1> to vector<16x128xi1>
    %25 = vector.broadcast %cst : f32 to vector<16x128xf32>
    %26 = arith.select %24, %22, %25 : vector<16x128xi1>, vector<16x128xf32>
    %c15_i32_6 = arith.constant 15 : i32
    %27 = tpu.dynamic_rotate %0 by %c15_i32_6 dim 0 : vector<16x128xf32>, i32 -> vector<16x128xf32>
    %cst_7 = arith.constant 0.000000e+00 : f32
    %28 = vector.shape_cast %21 : vector<16x1xi1> to vector<16x1xi1>
    %29 = vector.broadcast %28 : vector<16x1xi1> to vector<16x128xi1>
    %30 = vector.broadcast %cst_7 : f32 to vector<16x128xf32>
    %31 = arith.select %29, %27, %30 : vector<16x128xi1>, vector<16x128xf32>
    %32 = arith.truncf %26 : vector<16x128xf32> to vector<16x128xbf16>
    %c0_8 = arith.constant 0 : index
    %c0_9 = arith.constant 0 : index
    %c0_10 = arith.constant 0 : index
    %33 = vector.load %arg2[%c0_8, %c0_9, %c0_10] : memref<3x128x128xbf16, #tpu.memory_space<vmem>>, vector<1x128x128xbf16>
    %34 = vector.shape_cast %33 : vector<1x128x128xbf16> to vector<128x128xbf16>
    %cst_11 = arith.constant dense<0.000000e+00> : vector<16x128xf32>
    %35 = tpu.matmul %32, %34, %cst_11 {dimension_numbers = #tpu.dot_dimension_numbers<[1], [0], [0], [1], [0, 0, 1, 1], [], []>} : vector<16x128xbf16>, vector<128x128xbf16>, vector<16x128xf32> -> vector<16x128xf32>
    %36 = arith.truncf %0 : vector<16x128xf32> to vector<16x128xbf16>
    %c1 = arith.constant 1 : index
    %c0_12 = arith.constant 0 : index
    %c0_13 = arith.constant 0 : index
    %37 = vector.load %arg2[%c1, %c0_12, %c0_13] : memref<3x128x128xbf16, #tpu.memory_space<vmem>>, vector<1x128x128xbf16>
    %38 = vector.shape_cast %37 : vector<1x128x128xbf16> to vector<128x128xbf16>
    %cst_14 = arith.constant dense<0.000000e+00> : vector<16x128xf32>
    %39 = tpu.matmul %36, %38, %cst_14 {dimension_numbers = #tpu.dot_dimension_numbers<[1], [0], [0], [1], [0, 0, 1, 1], [], []>} : vector<16x128xbf16>, vector<128x128xbf16>, vector<16x128xf32> -> vector<16x128xf32>
    %40 = arith.addf %35, %39 : vector<16x128xf32>
    %41 = arith.truncf %31 : vector<16x128xf32> to vector<16x128xbf16>
    %c2 = arith.constant 2 : index
    %c0_15 = arith.constant 0 : index
    %c0_16 = arith.constant 0 : index
    %42 = vector.load %arg2[%c2, %c0_15, %c0_16] : memref<3x128x128xbf16, #tpu.memory_space<vmem>>, vector<1x128x128xbf16>
    %43 = vector.shape_cast %42 : vector<1x128x128xbf16> to vector<128x128xbf16>
    %cst_17 = arith.constant dense<0.000000e+00> : vector<16x128xf32>
    %44 = tpu.matmul %41, %43, %cst_17 {dimension_numbers = #tpu.dot_dimension_numbers<[1], [0], [0], [1], [0, 0, 1, 1], [], []>} : vector<16x128xbf16>, vector<128x128xbf16>, vector<16x128xf32> -> vector<16x128xf32>
    %45 = arith.addf %40, %44 : vector<16x128xf32>
    %c0_18 = arith.constant 0 : index
    %c0_19 = arith.constant 0 : index
    %46 = vector.load %arg3[%c0_18, %c0_19] : memref<1x128xf32, #tpu.memory_space<vmem>>, vector<1x128xf32>
    %47 = vector.broadcast %46 : vector<1x128xf32> to vector<16x128xf32>
    %48 = arith.addf %45, %47 : vector<16x128xf32>
    %cst_20 = arith.constant 0.000000e+00 : f32
    %49 = vector.broadcast %cst_20 : f32 to vector<16x128xf32>
    %50 = arith.maximumf %48, %49 : vector<16x128xf32>
    %c1_i32_21 = arith.constant 1 : i32
    %51 = tpu.dynamic_rotate %50 by %c1_i32_21 dim 0 : vector<16x128xf32>, i32 -> vector<16x128xf32>
    %cst_22 = arith.constant 0.000000e+00 : f32
    %52 = vector.shape_cast %19 : vector<16x1xi1> to vector<16x1xi1>
    %53 = vector.broadcast %52 : vector<16x1xi1> to vector<16x128xi1>
    %54 = vector.broadcast %cst_22 : f32 to vector<16x128xf32>
    %55 = arith.select %53, %51, %54 : vector<16x128xi1>, vector<16x128xf32>
    %c15_i32_23 = arith.constant 15 : i32
    %56 = tpu.dynamic_rotate %50 by %c15_i32_23 dim 0 : vector<16x128xf32>, i32 -> vector<16x128xf32>
    %cst_24 = arith.constant 0.000000e+00 : f32
    %57 = vector.shape_cast %21 : vector<16x1xi1> to vector<16x1xi1>
    %58 = vector.broadcast %57 : vector<16x1xi1> to vector<16x128xi1>
    %59 = vector.broadcast %cst_24 : f32 to vector<16x128xf32>
    %60 = arith.select %58, %56, %59 : vector<16x128xi1>, vector<16x128xf32>
    %61 = arith.truncf %55 : vector<16x128xf32> to vector<16x128xbf16>
    %c0_25 = arith.constant 0 : index
    %c0_26 = arith.constant 0 : index
    %c0_27 = arith.constant 0 : index
    %62 = vector.load %arg4[%c0_25, %c0_26, %c0_27] : memref<3x128x128xbf16, #tpu.memory_space<vmem>>, vector<1x128x128xbf16>
    %63 = vector.shape_cast %62 : vector<1x128x128xbf16> to vector<128x128xbf16>
    %cst_28 = arith.constant dense<0.000000e+00> : vector<16x128xf32>
    %64 = tpu.matmul %61, %63, %cst_28 {dimension_numbers = #tpu.dot_dimension_numbers<[1], [0], [0], [1], [0, 0, 1, 1], [], []>} : vector<16x128xbf16>, vector<128x128xbf16>, vector<16x128xf32> -> vector<16x128xf32>
    %65 = arith.truncf %50 : vector<16x128xf32> to vector<16x128xbf16>
    %c1_29 = arith.constant 1 : index
    %c0_30 = arith.constant 0 : index
    %c0_31 = arith.constant 0 : index
    %66 = vector.load %arg4[%c1_29, %c0_30, %c0_31] : memref<3x128x128xbf16, #tpu.memory_space<vmem>>, vector<1x128x128xbf16>
    %67 = vector.shape_cast %66 : vector<1x128x128xbf16> to vector<128x128xbf16>
    %cst_32 = arith.constant dense<0.000000e+00> : vector<16x128xf32>
    %68 = tpu.matmul %65, %67, %cst_32 {dimension_numbers = #tpu.dot_dimension_numbers<[1], [0], [0], [1], [0, 0, 1, 1], [], []>} : vector<16x128xbf16>, vector<128x128xbf16>, vector<16x128xf32> -> vector<16x128xf32>
    %69 = arith.addf %64, %68 : vector<16x128xf32>
    %70 = arith.truncf %60 : vector<16x128xf32> to vector<16x128xbf16>
    %c2_33 = arith.constant 2 : index
    %c0_34 = arith.constant 0 : index
    %c0_35 = arith.constant 0 : index
    %71 = vector.load %arg4[%c2_33, %c0_34, %c0_35] : memref<3x128x128xbf16, #tpu.memory_space<vmem>>, vector<1x128x128xbf16>
    %72 = vector.shape_cast %71 : vector<1x128x128xbf16> to vector<128x128xbf16>
    %cst_36 = arith.constant dense<0.000000e+00> : vector<16x128xf32>
    %73 = tpu.matmul %70, %72, %cst_36 {dimension_numbers = #tpu.dot_dimension_numbers<[1], [0], [0], [1], [0, 0, 1, 1], [], []>} : vector<16x128xbf16>, vector<128x128xbf16>, vector<16x128xf32> -> vector<16x128xf32>
    %74 = arith.addf %69, %73 : vector<16x128xf32>
    %c0_37 = arith.constant 0 : index
    %c0_38 = arith.constant 0 : index
    %75 = vector.load %arg5[%c0_37, %c0_38] : memref<1x128xf32, #tpu.memory_space<vmem>>, vector<1x128xf32>
    %76 = vector.broadcast %75 : vector<1x128xf32> to vector<16x128xf32>
    %77 = arith.addf %74, %76 : vector<16x128xf32>
    %78 = arith.addf %77, %0 : vector<16x128xf32>
    %cst_39 = arith.constant 0.000000e+00 : f32
    %79 = vector.broadcast %cst_39 : f32 to vector<16x128xf32>
    %80 = arith.maximumf %78, %79 : vector<16x128xf32>
    %c0_40 = arith.constant 0 : index
    %c0_41 = arith.constant 0 : index
    %81 = vector.load %arg6[%c0_40, %c0_41] : memref<16x128xf32, #tpu.memory_space<vmem>>, vector<16x128xf32>
    tpu.vector_store %arg6[%c0_40, %c0_41], %80 {strides = array<i32>} : memref<16x128xf32, #tpu.memory_space<vmem>>, vector<16x128xf32>,
    return
  }
  func.func @transform_0(%arg0: i32) -> (i32, i32) {
    %c0_i32 = arith.constant 0 : i32
    %c0_i32_0 = arith.constant 0 : i32
    return %arg0, %c0_i32 : i32, i32
  }
  func.func @transform_1(%arg0: i32) -> (i32, i32, i32) {
    %c0_i32 = arith.constant 0 : i32
    %c0_i32_0 = arith.constant 0 : i32
    %c0_i32_1 = arith.constant 0 : i32
    %c0_i32_2 = arith.constant 0 : i32
    return %c0_i32, %c0_i32_0, %c0_i32_1 : i32, i32, i32
  }
  func.func @transform_2(%arg0: i32) -> (i32, i32) {
    %c0_i32 = arith.constant 0 : i32
    %c0_i32_0 = arith.constant 0 : i32
    %c0_i32_1 = arith.constant 0 : i32
    return %c0_i32, %c0_i32_0 : i32, i32
  }
  func.func @transform_3(%arg0: i32) -> (i32, i32, i32) {
    %c0_i32 = arith.constant 0 : i32
    %c0_i32_0 = arith.constant 0 : i32
    %c0_i32_1 = arith.constant 0 : i32
    %c0_i32_2 = arith.constant 0 : i32
    return %c0_i32, %c0_i32_0, %c0_i32_1 : i32, i32, i32
  }
  func.func @transform_4(%arg0: i32) -> (i32, i32) {
    %c0_i32 = arith.constant 0 : i32
    %c0_i32_0 = arith.constant 0 : i32
    %c0_i32_1 = arith.constant 0 : i32
    return %c0_i32, %c0_i32_0 : i32, i32
  }
  func.func @transform_5(%arg0: i32) -> (i32, i32) {
    %c0_i32 = arith.constant 0 : i32
    %c0_i32_0 = arith.constant 0 : i32
    return %arg0, %c0_i32 : i32, i32
  }
}

</mosaic_0001>

<bundles_post_ra>
// kernel: tpu_custom_call.1
= control target key start
LH: loop header
LB: loop body
LE: loop exit
PB: predicated region body
PF: predicated region fallthrough
CT: control target
= control target key end

     0   :  { %10 = vsyncpa [#allocation3], 0  ;;  %s2005_s0 = inlined_call_operand.hbm [shape: f32[32,128], index: 0, kind: input, shape index: {}]   ;;  %s2006_s1 = inlined_call_operand.hbm [shape: bf16[3,128,128], index: 1, kind: input, shape index: {}]   ;;  %s2007_s2 = inlined_call_operand.vmem [shape: f32[1,128], index: 2, kind: input, shape index: {}]   ;;  %s2008_s3 = inlined_call_operand.hbm [shape: bf16[3,128,128], index: 3, kind: input, shape index: {}]   ;;  %s2009_s4 = inlined_call_operand.vmem [shape: f32[1,128], index: 4, kind: input, shape index: {}]   ;;  %s2010_s5 = inlined_call_operand.hbm [shape: f32[32,128], index: 5, kind: output, shape index: {}]  }
   0x1   :  { %12 = vsyncpa [#allocation3 + $0x1], 0 }
   0x2   :  { %13 = vsyncpa [#allocation6], 0 }
   0x3   :  { %14 = vsyncpa [#allocation4], 0 }
   0x4   :  { %16 = vsyncpa [#allocation4 + $0x1], 0  ;;  %s1691_s18 = smov 0   ;;  %s1693_s19 = smov 0  }
   0x5   :  { %s1695_s20 = smov 0   ;;  %s1697_s21 = smov 0  }
   0x6 LB: > { %s1712_s22 = sadd.s32 4294967295, %s1646_s21   ;;  %s1118_s23 = sadd.s32 4294967294, %s1646_s21   ;;  %s1646_s21 = sphi %s1697_s21, %s2036_s21   ;;  %s1642_s20 = sphi %s1695_s20, %s2035_s20   ;;  %s1638_s19 = sphi %s1693_s19, %s2034_s19   ;;  %s1634_s18 = sphi %s1691_s18, %s2033_s18  }
   0x7   : > { %p42_p0 = scmp.ne.s32.totalorder %s1638_s19, %s1634_s18  ;;  %p2011_p1 = scmp.eq.s32.totalorder %s1712_s22, 0 }
   0x8   : > { %p156_p3 = scmp.eq.s32.totalorder %s1118_s23, 1  ;;  %p1119_p5 = scmp.ge.s32.totalorder %s1646_s21, 1 }
   0x9   : > { %p1721_p4 = por %p2011_p1, %p42_p0  ;;  %p163_p7 = scmp.lt.s32.totalorder %s1646_s21, 3 }
   0xa   : > { %p1726_p6 = por %p156_p3, %p42_p0  ;;  %s1648_s27 = smov [#allocation5]  }
   0xb   : > { %s2015_s24 = scalar_select %p1721_p4, 1, 0 }
   0xc   : > { %s2016_s25 = scalar_select %p1726_p6, 1, 0 }
   0xd   : > { %p1731_p8 = pnand %p1119_p5, %p163_p7  ;;  %s175_s28 = sshll.u32 %s1648_s27, 4  ;;  %s176_s28 = int_to_ptr.vmem [resolvable:$true] %s175_s28 }
   0xe   : > { %s1649_s30 = smov [#allocation7]   ;;  %s1509_s7 = scalar_lea.vmem %s176_s28, 3072 }
   0xf   : > { %s2017_s26 = scalar_select %p1731_p8, 1, 0 }
  0x10   : > { %p1386_p9 = pneg %p1731_p8  ;;  %s191_s6 = sshll.u32 %s1649_s30, 4  ;;  %s192_s6 = int_to_ptr.vmem [resolvable:$true] %s191_s6 }
  0x11   : > { %p1510_p13 = scmp.ne.s32.totalorder %s176_s28, %s1509_s7  ;;  %p1517_p5 = scmp.lt.s32.totalorder %s176_s28, %s176_s28 }
  0x12   : > { %p1740_p11 = pnand %p1386_p9, %p2011_p1  ;;  %p1518_p7 = scmp.lt.s32.totalorder %s1509_s7, %s1509_s7 }
  0x14   : > { %p1500_p12 = pneg %p1740_p11  ;;  %p1519_p10 = por %p1518_p7, %p1517_p5 }
  0x16   : > { %p1512_p0 = pnand %p1510_p13, %p1500_p12 }
  0x18   : > { %p1513_p3 = pneg %p1512_p0 }
  0x1a   : > { %p1520_p9 = pnand %p1519_p10, %p1513_p3 }
  0x1c   : > { %1523 = shalt.err (!%p1520_p9)
}
  0x1d   : > { %s1650_s8 = smov 64   ;;  %s1651_s9 = smov 4  }
  0x1e   : > { %1389 = dma.hbm_to_vmem [thread:$0]  (!%p1740_p11), %s2006_s1, 3072, %s176_s28, [#allocation6], %s1650_s8, %s1650_s8, %s1651_s9  }
  0x1f   : > { %s1535_s12 = scalar_lea.vmem %s192_s6, 3072  ;;  %p1543_p2 = scmp.lt.s32.totalorder %s192_s6, %s192_s6 }
  0x20   : > { %p1536_p1 = scmp.ne.s32.totalorder %s192_s6, %s1535_s12  ;;  %p1544_p6 = scmp.lt.s32.totalorder %s1535_s12, %s1535_s12 }
  0x22   : > { %p1538_p13 = pnand %p1536_p1, %p1500_p12  ;;  %p1545_p5 = por %p1544_p6, %p1543_p2 }
  0x24   : > { %p1539_p0 = pneg %p1538_p13 }
  0x26   : > { %p1546_p10 = pnand %p1545_p5, %p1539_p0 }
  0x28   : > { %1549 = shalt.err (!%p1546_p10)
}
  0x29   : > { %1392 = dma.hbm_to_vmem [thread:$0]  (!%p1740_p11), %s2008_s3, 3072, %s192_s6, [#allocation6], %s1650_s8, %s1650_s8, %s1651_s9  }
  0x2a   : > { %s1763_s15 = sadd.s32 1, %s1646_s21   ;;  %s29_s16 = sadd.s32 1, %s1642_s20 }
  0x2b   : > { %s26_s17 = ssub.s32 %s1646_s21, %s1763_s15  ;;  %p36_p1 = scmp.ne.s32.totalorder %s1642_s20, %s1638_s19 }
  0x2c   : > { %p27_p2 = scmp.eq.s32.totalorder %s26_s17, 0  ;;  %p37_p6 = scmp.eq.s32.totalorder %s1646_s21, 0 }
  0x2d   : > { %p2019_p12 = scmp.eq.s32.totalorder %s1712_s22, 1  ;;  %p1403_p7 = scmp.lt.s32.totalorder %s1646_s21, 2 }
  0x2e   : > { %s1779_s27 = scalar_select %p27_p2, %s1642_s20, %s29_s16  }
  0x2f   : > { %p1773_p3 = por %p2019_p12, %p36_p1  ;;  %p38_p9 = por %p37_p6, %p36_p1 }
  0x30   : > { %s208_s28 = sand.u32 1, %s1642_s20   ;;  %s1198_s30 = sshll.u32 %s1646_s21, 8 }
  0x31   : > { %s2020_s23 = scalar_select %p1773_p3, 1, 0 }
  0x32   : > { %s1123_s29 = sshll.u32 %s208_s28, 4  ;;  %s1786_s8 = scalar_lea.hbm %s2005_s0, %s1198_s30 }
  0x33   : > { %s212_s9 = scalar_lea.vmem [#allocation2], %s1123_s29  ;;  %p1790_p11 = pnand %p1403_p7, %p38_p9 }
  0x34   : > { %s219_s10 = sshll.u32 %s212_s9, 4  ;;  %s1794_s12 = scalar_lea.sflag [#allocation3], %s208_s28  ;;  %s1788_s10 = int_to_ptr.vmem [resolvable:$true] %s219_s10 }
  0x35   : > { %s1550_s13 = scalar_lea.hbm %s1786_s8, 256  ;;  %p1552_p0 = pneg %p1790_p11 }
  0x36   : > { %p1551_p13 = scmp.ne.s32.totalorder %s1786_s8, %s1550_s13  ;;  %s1555_s17 = scalar_lea.hbm %s2005_s0, 512 }
  0x37   : > { %p1556_p1 = scmp.lt.s32.totalorder %s1786_s8, %s2005_s0  ;;  %p1557_p2 = scmp.lt.s32.totalorder %s1555_s17, %s1550_s13 }
  0x38   : > { %p1553_p5 = pnand %p1552_p0, %p1551_p13 }
  0x39   : > { %p1558_p6 = por %p1557_p2, %p1556_p1 }
  0x3a   : > { %p1554_p10 = pneg %p1553_p5 }
  0x3c   : > { %p1559_p12 = pnand %p1558_p6, %p1554_p10 }
  0x3e   : > { %1562 = shalt.err (!%p1559_p12)
}
  0x3f   : > { %s1563_s28 = scalar_lea.vmem %s1788_s10, 256  ;;  %s1652_s6 = smov [#allocation2]  }
  0x40   : > { %p1564_p7 = scmp.ne.s32.totalorder %s1788_s10, %s1563_s28  ;;  %s1568_s7 = sshll.u32 %s1652_s6, 4  ;;  %s1569_s7 = int_to_ptr.vmem [resolvable:$false] %s1568_s7 }
  0x41   : > { %s1570_s9 = scalar_lea.vmem %s1569_s7, 512  ;;  %p1571_p5 = scmp.lt.s32.totalorder %s1788_s10, %s1569_s7 }
  0x42   : > { %p1566_p9 = pnand %p1564_p7, %p1552_p0  ;;  %p1572_p3 = scmp.lt.s32.totalorder %s1570_s9, %s1563_s28 }
  0x44   : > { %p1567_p13 = pneg %p1566_p9  ;;  %p1573_p4 = por %p1572_p3, %p1571_p5 }
  0x46   : > { %p1574_p8 = pnand %p1573_p4, %p1567_p13 }
  0x48   : > { %1577 = shalt.err (!%p1574_p8)
}
  0x49   : > { %s1653_s13 = smov 128   ;;  %s1654_s14 = smov 8  }
  0x4a   : > { %1396 = dma.hbm_to_vmem [thread:$0]  (!%p1790_p11), %s1786_s8, 256, %s1788_s10, %s1794_s12, %s1653_s13, %s1653_s13, %s1654_s14  }
  0x4b   : > { %p2022_p0 = scmp.ne.s32.totalorder %s2017_s26, 0 }
  0x4c   : > { %s1818_s16 = sand.u32 (!%p2022_p0), 1, %s1638_s19   ;;  %p2023_p4 = scmp.ne.s32.totalorder (!%p2022_p0), %s2015_s24, 0 }
  0x4d   : > { %231 = sbr.rel (%p2022_p0) target bundleno = 608 (0x260), region = 40  ;;  %s1127_s17 = sshll.u32 (!%p2022_p0), %s1818_s16, 4 }
  0x4e   : > { %s234_s29 = scalar_lea.sflag (!%p2022_p0), [#allocation3], %s1818_s16  ;;  %s1824_s30 = scalar_lea.vmem (!%p2022_p0), [#allocation2], %s1127_s17 }
  0x52   : > { %1621 = dma.done.wait (%p2023_p4), %s234_s29, 256  }
  0x53   : > { %1623 = vsyncadd (%p2023_p4), %s234_s29, 4294967040  ;;  %p2024_p8 = scmp.eq.s32.totalorder %s1712_s22, 0 }
  0x55   : > { %1625 = dma.done.wait (%p2024_p8), [#allocation6], 6144   ;;  %p2025_p3 = pmov %p2024_p8 }
  0x56   : > { %v1655_v0 = vmov 0.0   ;;  %vm1656_vm0 = vmmov 0   ;;  %v1450_v1 = vld [vmem:[#allocation5 + $0x78] sm:$0xff]   ;;  %v1452_v3 = vld [vmem:[#allocation5 + $0x70] sm:$0xff]   ;;  %v1454_v5 = vld [vmem:[#allocation5 + $0x68] sm:$0xff]   ;;  %v277_v8 = vlaneseq  ;;  %vm1657_vm3 = vmmov 1  }
  0x57   : > { %1627 = vsyncadd (%p2025_p3), [#allocation6], 4294961152  ;;  %1254 = vmatprep.subr.bf16.mxu0 %v1655_v0  ;;  %1274 = vmatprep.subr.bf16.mxu1 %v1655_v0  ;;  %v1451_v2 = vld [vmem:[#allocation5 + $0x38] sm:$0xff]   ;;  %v1453_v4 = vld [vmem:[#allocation5 + $0x30] sm:$0xff]   ;;  %s271_s11 = scalar_lea.vmem [#allocation8], %s1127_s17  ;;  %s1199_s28 = sshll.u32 %s1712_s22, 8 }
  0x58   : > { %1270 = vmatprep.mubr.msk.bf16.mxu0 %vm1656_vm0, %v1655_v0  ;;  %1290 = vmatprep.mubr.msk.bf16.mxu1 %vm1656_vm0, %v1655_v0  ;;  %v1455_v6 = vld [vmem:[#allocation5 + $0x28] sm:$0xff]   ;;  %v1456_v7 = vld [vmem:[#allocation5 + $0x60] sm:$0xff]   ;;  %v1458_v10 = vld [vmem:[#allocation5 + $0x58] sm:$0xff]   ;;  %v1846_v11 = vshrl.u32 %v277_v8, 7  ;;  %s1026_s12 = sshll.u32 %s271_s11, 4  ;;  %s1962_s9 = scalar_lea.hbm %s2010_s5, %s1199_s28  ;;  %s1956_s12 = int_to_ptr.vmem [resolvable:$true] %s1026_s12 }
  0x59   : > { %1255 = vmatpush3.bf16.msra.mxu0 %v1450_v1  ;;  %1275 = vmatpush3.bf16.msra.mxu1 %v1451_v2  ;;  %v1457_v9 = vld [vmem:[#allocation5 + $0x20] sm:$0xff]   ;;  %v1459_v12 = vld [vmem:[#allocation5 + $0x18] sm:$0xff]   ;;  %v1460_v13 = vld [vmem:[#allocation5 + $0x50] sm:$0xff]   ;;  %s1013_s13 = scalar_lea.sflag [#allocation4], %s1818_s16  ;;  %s1578_s14 = scalar_lea.vmem %s1956_s12, 256 }
  0x5a   : > { %1256 = vmatprep.subr.bf16.mxu0 %v1655_v0  ;;  %1276 = vmatprep.subr.bf16.mxu1 %v1655_v0  ;;  %v1461_v14 = vld [vmem:[#allocation5 + $0x10] sm:$0xff]   ;;  %v284_v15 = vand.u32 15, %v1846_v11  ;;  %v1857_v17 = vld [vmem:[%s1824_s30 + $0x8] sm:$0xff]  ;;  %v1464_v22 = vld [vmem:[#allocation5 + $0x40] sm:$0xff]   ;;  %vm310_vm2 = vcmp.lt.s32.totalorder %v1846_v11, 1  ;;  %v279_v35 = vadd.s32 8, %v1846_v11  ;;  %p1579_p11 = scmp.ne.s32.totalorder %s1956_s12, %s1578_s14 }
  0x5b   : > { %v1853_v16 = vld [vmem:[%s1824_s30] sm:$0xff]  ;;  %v1462_v18 = vld [vmem:[#allocation5 + $0x48] sm:$0xff]   ;;  %v309_v21 = vrot.slane %v1857_v17, 7  ;;  %v1466_v27 = vld [vmem:[#allocation5 + $0xb8] sm:$0xff]   ;;  %v320_v37 = vrot.slane %v1857_v17, 1  ;;  %vm321_vm5 = vcmp.lt.s32.totalorder %v1846_v11, 7 }
  0x5c   : > { %v1463_v19 = vld [vmem:[#allocation5 + $0x8] sm:$0xff]   ;;  %vm304_vm1 = vcmp.ne.s32.totalorder %v284_v15, 0  ;;  %v308_v20 = vrot.slane %v1853_v16, 7  ;;  %v1465_v23 = vld [vmem:[#allocation5] sm:$0xff]   ;;  %v347_v28 = vpack.c.bf16 %v1857_v17, %v1853_v16  ;;  %v1467_v30 = vld [vmem:[#allocation5 + $0xb0] sm:$0xff]   ;;  %v319_v36 = vrot.slane %v1853_v16, 1 }
  0x5d   : > { %1257 = vmatpush3.bf16.msra.mxu0 %v1452_v3  ;;  %1277 = vmatpush3.bf16.msra.mxu1 %v1453_v4  ;;  %vm1865_vm4 = vmpackc.low %vm1657_vm3, %vm304_vm1  ;;  %v1468_v31 = vld [vmem:[#allocation5 + $0xa8] sm:$0xff]   ;;  %v1469_v32 = vld [vmem:[#allocation5 + $0xa0] sm:$0xff]   ;;  %v291_v39 = vand.u32 15, %v279_v35  ;;  %p2030_p10 = scmp.ne.s32.totalorder %s2020_s23, 0  ;;  %s1658_s22 = smov [#allocation8]  }
  0x5e   : > { %1258 = vmatprep.subr.bf16.mxu0 %v1655_v0  ;;  %1278 = vmatprep.subr.bf16.mxu1 %v1655_v0  ;;  %v311_v25 = vsel %vm310_vm2, %v308_v20, %v309_v21  ;;  %v312_v26 = vsel %vm310_vm2, %v309_v21, %v308_v20  ;;  %v1470_v33 = vld [vmem:[#allocation5 + $0x98] sm:$0xff]   ;;  %v1471_v34 = vld [vmem:[#allocation5 + $0x90] sm:$0xff]   ;;  %v1472_v38 = vld [vmem:[#allocation5 + $0x88] sm:$0xff]   ;;  %v322_v41 = vsel %vm321_vm5, %v319_v36, %v320_v37  ;;  %s1582_s17 = sshll.u32 %s1658_s22, 4  ;;  %s1583_s17 = int_to_ptr.vmem [resolvable:$false] %s1582_s17 }
  0x5f   : > { %v1148_v29 = vpack.c.bf16 %v311_v25, %v312_v26  ;;  %v1473_v40 = vld [vmem:[#allocation5 + $0x80] sm:$0xff]   ;;  %v323_v42 = vsel %vm321_vm5, %v320_v37, %v319_v36  ;;  %vm307_vm6 = vcmp.ne.s32.totalorder %v291_v39, 15  ;;  %v1474_v45 = vld [vmem:[#allocation7 + $0x78] sm:$0xff]   ;;  %v1475_v47 = vld [vmem:[#allocation7 + $0x70] sm:$0xff]   ;;  %p1580_p1 = pnand %p1579_p11, %p2030_p10  ;;  %s1584_s29 = scalar_lea.vmem %s1583_s17, 512 }
  0x60   : > { %v1159_v43 = vpack.c.bf16 %v323_v42, %v322_v41  ;;  %vm1901_vm7 = vmpackc.low %vm307_vm6, %vm1657_vm3  ;;  %v1476_v46 = vld [vmem:[#allocation7 + $0x38] sm:$0xff]   ;;  %v1478_v48 = vld [vmem:[#allocation7 + $0x30] sm:$0xff]   ;;  %p1585_p6 = scmp.lt.s32.totalorder %s1956_s12, %s1583_s17  ;;  %p1586_p12 = scmp.lt.s32.totalorder %s1584_s29, %s1578_s14 }
  0x61   : > { %1259 = vmatpush3.bf16.msra.mxu0 %v1454_v5  ;;  %1279 = vmatpush3.bf16.msra.mxu1 %v1455_v6  ;;  %v1477_v49 = vld [vmem:[#allocation7 + $0x68] sm:$0xff]   ;;  %v1479_v51 = vld [vmem:[#allocation7 + $0x60] sm:$0xff]   ;;  %v1481_v53 = vld [vmem:[#allocation7 + $0x58] sm:$0xff]   ;;  %p1581_p2 = pneg %p1580_p1 }
  0x62   : > { %1260 = vmatprep.subr.bf16.mxu0 %v1655_v0  ;;  %1280 = vmatprep.subr.bf16.mxu1 %v1655_v0  ;;  %v1480_v50 = vld [vmem:[#allocation7 + $0x28] sm:$0xff]   ;;  %v1482_v52 = vld [vmem:[#allocation7 + $0x20] sm:$0xff]   ;;  %v1483_v54 = vld [vmem:[#allocation7 + $0x50] sm:$0xff]   ;;  %p1587_p7 = por %p1586_p12, %p1585_p6 }
  0x63   : > { %v1484_v55 = vld [vmem:[#allocation7 + $0x18] sm:$0xff]   ;;  %v1485_v56 = vld [vmem:[#allocation7 + $0x48] sm:$0xff]   ;;  %v1486_v57 = vld [vmem:[#allocation7 + $0x10] sm:$0xff]  }
  0x64   : > { %v1487_v58 = vld [vmem:[#allocation7 + $0x40] sm:$0xff]   ;;  %v1488_v59 = vld [vmem:[#allocation7 + $0x8] sm:$0xff]   ;;  %p1588_p9 = pnand %p1587_p7, %p1581_p2 }
  0x65   : > { %1261 = vmatpush3.bf16.msra.mxu0 %v1456_v7  ;;  %1281 = vmatpush3.bf16.msra.mxu1 %v1457_v9  ;;  %v1489_v60 = vld [vmem:[#allocation7] sm:$0xff]   ;;  %v1496_v35 = vld [vmem:[#allocation7 + $0x88] sm:$0xff]  }
  0x66   : > { %1262 = vmatprep.subr.bf16.mxu0 %v1655_v0  ;;  %1282 = vmatprep.subr.bf16.mxu1 %v1655_v0  ;;  %v1161_v8 = vld [vmem:[%s2007_s2] ss:$0 sm:$0xff] }
  0x67   : > { %v1497_v37 = vld [vmem:[#allocation7 + $0x80] sm:$0xff]  }
  0x68   : > { %v1192_v11 = vld [vmem:[%s2009_s4] ss:$0 sm:$0xff] }
  0x69   : > { %1263 = vmatpush3.bf16.msra.mxu0 %v1458_v10  ;;  %1283 = vmatpush3.bf16.msra.mxu1 %v1459_v12 }
  0x6a   : > { %1264 = vmatprep.subr.bf16.mxu0 %v1655_v0  ;;  %1284 = vmatprep.subr.bf16.mxu1 %v1655_v0 }
  0x6d   : > { %1265 = vmatpush3.bf16.msra.mxu0 %v1460_v13  ;;  %1285 = vmatpush3.bf16.msra.mxu1 %v1461_v14 }
  0x6e   : > { %1266 = vmatprep.subr.bf16.mxu0 %v1655_v0  ;;  %1286 = vmatprep.subr.bf16.mxu1 %v1655_v0 }
  0x71   : > { %1267 = vmatpush3.bf16.msra.mxu0 %v1462_v18  ;;  %1287 = vmatpush3.bf16.msra.mxu1 %v1463_v19 }
  0x72   : > { %1268 = vmatprep.subr.bf16.mxu0 %v1655_v0  ;;  %1288 = vmatprep.subr.bf16.mxu1 %v1655_v0 }
  0x75   : > { %1269 = vmatpush3.bf16.msra.mxu0 %v1464_v22  ;;  %1289 = vmatpush3.bf16.msra.mxu1 %v1465_v23  ;;  %v1490_v22 = vld [vmem:[#allocation7 + $0xb8] sm:$0xff]  }
  0x76   : > { %1294 = vmatprep.subr.bf16.mxu0 %v1655_v0  ;;  %1314 = vmatprep.subr.bf16.mxu1 %v1655_v0 }
  0x78   : > { %1271 = vmatmul.mubr.bf16.vlgmr.msra.gmra.mxu0 %v347_v28  ;;  %1291 = vmatmul.mubr.msk.bf16.vlgmr.msra.gmra.mxu1 %vm1865_vm4, %v1148_v29 }
  0x79   : > { %1295 = vmatpush3.bf16.msra.mxu0 %v1466_v27  ;;  %1310 = vmatprep.mubr.msk.bf16.mxu0 %vm1656_vm0, %v1655_v0 }
  0x7a   : > { %1296 = vmatprep.subr.bf16.mxu0 %v1655_v0  ;;  %1330 = vmatprep.mubr.msk.bf16.mxu1 %vm1656_vm0, %v1655_v0 }
  0x7b   : > { %1315 = vmatpush3.bf16.msra.mxu1 %v1474_v45 }
  0x7c   : > { %1316 = vmatprep.subr.bf16.mxu1 %v1655_v0 }
  0x7d   : > { %1297 = vmatpush3.bf16.msra.mxu0 %v1467_v30  ;;  %v1491_v30 = vld [vmem:[#allocation7 + $0xb0] sm:$0xff]  }
  0x7e   : > { %1298 = vmatprep.subr.bf16.mxu0 %v1655_v0 }
  0x7f   : > { %1317 = vmatpush3.bf16.msra.mxu1 %v1475_v47 }
  0x80   : > { %1318 = vmatprep.subr.bf16.mxu1 %v1655_v0 }
  0x81   : > { %1299 = vmatpush3.bf16.msra.mxu0 %v1468_v31  ;;  %v1492_v31 = vld [vmem:[#allocation7 + $0xa8] sm:$0xff]  }
  0x82   : > { %1300 = vmatprep.subr.bf16.mxu0 %v1655_v0 }
  0x83   : > { %1319 = vmatpush3.bf16.msra.mxu1 %v1477_v49 }
  0x84   : > { %1320 = vmatprep.subr.bf16.mxu1 %v1655_v0 }
  0x85   : > { %1301 = vmatpush3.bf16.msra.mxu0 %v1469_v32  ;;  %v1493_v32 = vld [vmem:[#allocation7 + $0xa0] sm:$0xff]  }
  0x86   : > { %1302 = vmatprep.subr.bf16.mxu0 %v1655_v0 }
  0x87   : > { %1321 = vmatpush3.bf16.msra.mxu1 %v1479_v51 }
  0x88   : > { %1322 = vmatprep.subr.bf16.mxu1 %v1655_v0 }
  0x89   : > { %1303 = vmatpush3.bf16.msra.mxu0 %v1470_v33  ;;  %v1494_v33 = vld [vmem:[#allocation7 + $0x98] sm:$0xff]  }
  0x8a   : > { %1304 = vmatprep.subr.bf16.mxu0 %v1655_v0 }
  0x8b   : > { %1323 = vmatpush3.bf16.msra.mxu1 %v1481_v53 }
  0x8c   : > { %1324 = vmatprep.subr.bf16.mxu1 %v1655_v0 }
  0x8d   : > { %1305 = vmatpush3.bf16.msra.mxu0 %v1471_v34  ;;  %v1495_v34 = vld [vmem:[#allocation7 + $0x90] sm:$0xff]  }
  0x8e   : > { %1306 = vmatprep.subr.bf16.mxu0 %v1655_v0 }
  0x8f   : > { %1325 = vmatpush3.bf16.msra.mxu1 %v1483_v54 }
  0x90   : > { %1326 = vmatprep.subr.bf16.mxu1 %v1655_v0 }
  0x91   : > { %1307 = vmatpush3.bf16.msra.mxu0 %v1472_v38 }
  0x92   : > { %1308 = vmatprep.subr.bf16.mxu0 %v1655_v0 }
  0x93   : > { %1327 = vmatpush3.bf16.msra.mxu1 %v1485_v56 }
  0x94   : > { %1328 = vmatprep.subr.bf16.mxu1 %v1655_v0 }
  0x95   : > { %1309 = vmatpush3.bf16.msra.mxu0 %v1473_v40 }
  0x96   : > { %1334 = vmatprep.subr.bf16.mxu0 %v1655_v0 }
  0x97   : > { %1329 = vmatpush3.bf16.msra.mxu1 %v1487_v58 }
  0x98   : > { %1311 = vmatmul.mubr.msk.bf16.vlgmr.msra.gmra.mxu0 %vm1901_vm7, %v1159_v43  ;;  %1354 = vmatprep.subr.bf16.mxu1 %v1655_v0 }
  0x99   : > { %1350 = vmatprep.mubr.msk.bf16.mxu0 %vm1656_vm0, %v1655_v0  ;;  %1335 = vmatpush3.bf16.msra.mxu0 %v1476_v46 }
  0x9a   : > { %1336 = vmatprep.subr.bf16.mxu0 %v1655_v0 }
  0x9d   : > { %1337 = vmatpush3.bf16.msra.mxu0 %v1478_v48 }
  0x9e   : > { %1338 = vmatprep.subr.bf16.mxu0 %v1655_v0 }
  0xa1   : > { %1339 = vmatpush3.bf16.msra.mxu0 %v1480_v50 }
  0xa2   : > { %1340 = vmatprep.subr.bf16.mxu0 %v1655_v0 }
  0xa5   : > { %1341 = vmatpush3.bf16.msra.mxu0 %v1482_v52 }
  0xa6   : > { %1342 = vmatprep.subr.bf16.mxu0 %v1655_v0 }
  0xa9   : > { %1343 = vmatpush3.bf16.msra.mxu0 %v1484_v55 }
  0xaa   : > { %1344 = vmatprep.subr.bf16.mxu0 %v1655_v0 }
  0xad   : > { %1345 = vmatpush3.bf16.msra.mxu0 %v1486_v57 }
  0xae   : > { %1346 = vmatprep.subr.bf16.mxu0 %v1655_v0 }
  0xb1   : > { %1347 = vmatpush3.bf16.msra.mxu0 %v1488_v59 }
  0xb2   : > { %1348 = vmatprep.subr.bf16.mxu0 %v1655_v0 }
  0xb5   : > { %1349 = vmatpush3.bf16.msra.mxu0 %v1489_v60 }
 0x138   : > { %v447_v61 = vpop.f32.mrf.mxu0  ;;  %v536_v62 = vpop.f32.mrf.mxu1 }
 0x139   : > { %v537_v6 = vadd.f32 %v536_v62, %v447_v61 }
 0x13a   : > { %v1272_v63 = vpop.f32.mrf.mxu0  ;;  %v1292_v1 = vpop.f32.mrf.mxu1 }
 0x13c   : > { %v450_v2 = vpop.f32.mrf.mxu0  ;;  %v539_v3 = vpop.f32.mrf.mxu1 }
 0x13d   : > { %v540_v12 = vadd.f32 %v539_v3, %v450_v2 }
 0x13e   : > { %v1273_v4 = vpop.f32.mrf.mxu0  ;;  %v1293_v5 = vpop.f32.mrf.mxu1 }
 0x158   : > { %v643_v7 = vpop.f32.mrf.mxu0 }
 0x159   : > { %v650_v9 = vadd.f32 %v643_v7, %v537_v6 }
 0x15a   : > { %v1312_v10 = vpop.f32.mrf.mxu0 }
 0x15b   : > { %v659_v13 = vadd.f32 %v1161_v8, %v650_v9 }
 0x15c   : > { %v646_v14 = vpop.f32.mrf.mxu0 }
 0x15d   : > { %v651_v15 = vadd.f32 %v646_v14, %v540_v12  ;;  %v661_v19 = vmax.f32 %v659_v13, 0.0 }
 0x15e   : > { %v1313_v18 = vpop.f32.mrf.mxu0 }
 0x15f   : > { %v660_v20 = vadd.f32 %v1161_v8, %v651_v15  ;;  %v663_v23 = vrot.slane %v661_v19, 7  ;;  %v669_v36 = vrot.slane %v661_v19, 1 }
 0x161   : > { %v662_v21 = vmax.f32 %v660_v20, 0.0 }
 0x163   : > { %v664_v25 = vrot.slane %v662_v21, 7  ;;  %v692_v26 = vpack.c.bf16 %v662_v21, %v661_v19  ;;  %v670_v24 = vrot.slane %v662_v21, 1 }
 0x165   : > { %v665_v27 = vsel %vm310_vm2, %v663_v23, %v664_v25  ;;  %v666_v28 = vsel %vm310_vm2, %v664_v25, %v663_v23  ;;  %1331 = vmatmul.mubr.bf16.vlgmr.msra.gmra.mxu1 %v692_v26  ;;  %v671_v38 = vsel %vm321_vm5, %v669_v36, %v670_v24  ;;  %v672_v39 = vsel %vm321_vm5, %v670_v24, %v669_v36 }
 0x166   : > { %1355 = vmatpush3.bf16.msra.mxu1 %v1490_v22  ;;  %v1179_v29 = vpack.c.bf16 %v665_v27, %v666_v28  ;;  %1370 = vmatprep.mubr.msk.bf16.mxu1 %vm1656_vm0, %v1655_v0  ;;  %v1190_v40 = vpack.c.bf16 %v672_v39, %v671_v38 }
 0x167   : > { %1356 = vmatprep.subr.bf16.mxu1 %v1655_v0 }
 0x168   : > { %1351 = vmatmul.mubr.msk.bf16.vlgmr.msra.gmra.mxu0 %vm1865_vm4, %v1179_v29 }
 0x16a   : > { %1357 = vmatpush3.bf16.msra.mxu1 %v1491_v30 }
 0x16b   : > { %1358 = vmatprep.subr.bf16.mxu1 %v1655_v0 }
 0x16e   : > { %1359 = vmatpush3.bf16.msra.mxu1 %v1492_v31 }
 0x16f   : > { %1360 = vmatprep.subr.bf16.mxu1 %v1655_v0 }
 0x172   : > { %1361 = vmatpush3.bf16.msra.mxu1 %v1493_v32 }
 0x173   : > { %1362 = vmatprep.subr.bf16.mxu1 %v1655_v0 }
 0x176   : > { %1363 = vmatpush3.bf16.msra.mxu1 %v1494_v33 }
 0x177   : > { %1364 = vmatprep.subr.bf16.mxu1 %v1655_v0 }
 0x17a   : > { %1365 = vmatpush3.bf16.msra.mxu1 %v1495_v34 }
 0x17b   : > { %1366 = vmatprep.subr.bf16.mxu1 %v1655_v0 }
 0x17e   : > { %1367 = vmatpush3.bf16.msra.mxu1 %v1496_v35 }
 0x17f   : > { %1368 = vmatprep.subr.bf16.mxu1 %v1655_v0 }
 0x182   : > { %1369 = vmatpush3.bf16.msra.mxu1 %v1497_v37 }
 0x185   : > { %1371 = vmatmul.mubr.msk.bf16.vlgmr.msra.gmra.mxu1 %vm1901_vm7, %v1190_v40 }
 0x225   : > { %v792_v41 = vpop.f32.mrf.mxu1 }
 0x227   : > { %v1332_v42 = vpop.f32.mrf.mxu1 }
 0x228   : > { %v881_v43 = vpop.f32.mrf.mxu0 }
 0x229   : > { %v795_v45 = vpop.f32.mrf.mxu1  ;;  %v882_v49 = vadd.f32 %v881_v43, %v792_v41 }
 0x22a   : > { %v1352_v46 = vpop.f32.mrf.mxu0 }
 0x22b   : > { %v1333_v47 = vpop.f32.mrf.mxu1 }
 0x22c   : > { %v884_v48 = vpop.f32.mrf.mxu0 }
 0x22d   : > { %v885_v44 = vadd.f32 %v884_v48, %v795_v45 }
 0x22e   : > { %v1353_v0 = vpop.f32.mrf.mxu0 }
 0x245   : > { %v988_v50 = vpop.f32.mrf.mxu1 }
 0x246   : > { %v995_v51 = vadd.f32 %v988_v50, %v882_v49 }
 0x247   : > { %v1372_v52 = vpop.f32.mrf.mxu1 }
 0x248   : > { %v1004_v53 = vadd.f32 %v1192_v11, %v995_v51 }
 0x249   : > { %v991_v54 = vpop.f32.mrf.mxu1 }
 0x24a   : > { %v1006_v55 = vadd.f32 %v1004_v53, %v1853_v16  ;;  %v996_v56 = vadd.f32 %v991_v54, %v885_v44 }
 0x24b   : > { %v1373_v57 = vpop.f32.mrf.mxu1 }
 0x24c   : > { %v1008_v58 = vmax.f32 %v1006_v55, 0.0  ;;  %v1005_v59 = vadd.f32 %v1192_v11, %v996_v56 }
 0x24e   : > { %1010 = vst [vmem:[%s271_s11] sm:$0xff] %v1008_v58  ;;  %v1007_v60 = vadd.f32 %v1005_v59, %v1857_v17 }
 0x250   : > { %v1009_v16 = vmax.f32 %v1007_v60, 0.0 }
 0x252   : > { %1011 = vst [vmem:[%s271_s11 + $0x8] sm:$0xff] %v1009_v16 }
 0x253   : > { %1591 = shalt.err (!%p1588_p9)
}
 0x254   : > { %s1592_s30 = scalar_lea.hbm %s1962_s9, 256  ;;  %s1596_s8 = scalar_lea.hbm %s2010_s5, 512 }
 0x255   : > { %p1593_p13 = scmp.ne.s32.totalorder %s1962_s9, %s1592_s30  ;;  %p1597_p4 = scmp.lt.s32.totalorder %s1962_s9, %s2010_s5 }
 0x256   : > { %p1598_p8 = scmp.lt.s32.totalorder %s1596_s8, %s1592_s30 }
 0x257   : > { %p1594_p5 = pnand %p1593_p13, %p2030_p10 }
 0x258   : > { %p1599_p3 = por %p1598_p8, %p1597_p4 }
 0x259   : > { %p1595_p0 = pneg %p1594_p5 }
 0x25b   : > { %p1600_p11 = pnand %p1599_p3, %p1595_p0 }
 0x25d   : > { %1603 = shalt.err (!%p1600_p11)
}
 0x25e   : > { %s1659_s28 = smov 128   ;;  %s1660_s6 = smov 8  }
 0x25f   : > { %1384 = dma.vmem_to_hbm [thread:$0]  (%p2030_p10), %s1956_s12, 256, %s1962_s9, %s1013_s13, %s1659_s28, %s1659_s28, %s1660_s6  }
 0x260 PF: > { %s1041_s7 = sand.u32 1, %s1634_s18   ;;  %p2031_p1 = scmp.ne.s32.totalorder %s2016_s25, 0 }
 0x261   : > { %p2032_p2 = scmp.ge.s32.totalorder %s1646_s21, 2  ;;  %s1042_s14 = scalar_lea.sflag [#allocation4], %s1041_s7 }
 0x263   : > { %p1398_p6 = pnand %p2032_p2, %p2031_p1 }
 0x265   : > { %p1399_p12 = pneg %p1398_p6 }
 0x267   : > { %1629 = dma.done.wait (%p1399_p12), %s1042_s14, 256  }
 0x268   : > { %1631 = vsyncadd (%p1399_p12), %s1042_s14, 4294967040  ;;  %p19_p7 = scmp.ge.s32.totalorder %s1763_s15, 4   ;;  %s2033_s18 = smov %s1638_s19 }
 0x269   : > { %s2034_s19 = smov %s1642_s20  ;;  %s2035_s20 = smov %s1779_s27 }
 0x26a   : > { %s2036_s21 = smov %s1763_s15  ;;  %21 = sbr.rel (!%p19_p7) target bundleno = 6 (0x6), region = 97 }
 0x26f   :  { %1047 = vsyncpa [#allocation3], 1 }
 0x270   :  { %1049 = vsyncpa [#allocation3 + $0x1], 1 }
 0x271   :  { %1050 = vsyncpa [#allocation6], 1 }
 0x272   :  { %1051 = vsyncpa [#allocation4], 1 }
 0x273   :  { %1053 = vsyncpa [#allocation4 + $0x1], 1 }

</bundles_post_ra>
